<compile_context>
chip_gen: v5e
topology: v5e:2x2
jax: 0.10.0
libtpu: 0.0.40
codegen_flags: <defaults>
</compile_context>

<pallas_src>
import jax
import jax.numpy as jnp
from jax.experimental import pallas as pl
from jax.experimental.pallas import tpu as pltpu


def _round_up(n: int, m: int) -> int:
    return ((n + m - 1) // m) * m


def make_net_forward(w1, b1, w2, b2, w3, b3, *, max_batch_tile=1024):
    """One-time parameter prep + returns a jitted forward(x) -> (batch, n_out).

    All padding / transposition / bf16 casting of the parameters happens here,
    once, so the per-call path is just: x.T -> pallas_call -> out.T.
    """
    n_feature, n_h1 = w1.shape
    _, n_h2 = w2.shape
    _, n_out = w3.shape

    # MXU-friendly padded widths.  Hidden widths pad to 128 (lane/MXU width);
    # the output only pads its sublane dim to 8 -- the stored output stays at
    # the true n_out width (lane axis of the output block is the batch tile).
    h1p = _round_up(n_h1, 128)
    h2p = _round_up(n_h2, 128)
    outp = _round_up(n_out, 8)

    f32, bf16 = jnp.float32, jnp.bfloat16

    # Transposed (out_features, in_features) weights, zero-padded, bf16.
    # Zero padding is exact: padded units are ReLU(0 + 0) = 0 and contribute
    # nothing downstream.
    w1t = jnp.zeros((h1p, n_feature), bf16).at[:n_h1, :].set(w1.T.astype(bf16))
    w2t = jnp.zeros((h2p, h1p), bf16).at[:n_h2, :n_h1].set(w2.T.astype(bf16))
    w3t = jnp.zeros((outp, h2p), bf16).at[:n_out, :n_h2].set(w3.T.astype(bf16))

    # Biases as f32 column vectors (width, 1): directly lane-broadcast over the
    # batch (lane) axis in the transposed formulation.  They are tiny and stay
    # VMEM-resident via constant index_maps.
    b1t = jnp.zeros((h1p, 1), f32).at[:n_h1, 0].set(b1.reshape(-1).astype(f32))
    b2t = jnp.zeros((h2p, 1), f32).at[:n_h2, 0].set(b2.reshape(-1).astype(f32))
    b3t = jnp.zeros((outp, 1), f32).at[:n_out, 0].set(b3.reshape(-1).astype(f32))

    def forward(x):
        batch, nf = x.shape
        assert nf == n_feature, "feature dim mismatch"

        # Batch tile lives on the lane axis of every block.
        if batch <= 128:
            tile_b = batch                       # single block == full array
        else:
            tile_b = min(_round_up(max_batch_tile, 128), (batch // 128) * 128)
            if batch >= 256:
                # >= 2 grid steps so megacore / v7x dual-TC sharding has work.
                tile_b = min(tile_b, _round_up(pl.cdiv(batch, 2), 128))
        grid = (pl.cdiv(batch, tile_b),)         # ragged final block is fine

        # Tiny layout plumbing: present x with batch on lanes.
        x_t = x.T                                # (n_feature, batch)

        def mlp_kernel(x_ref, w1_ref, w2_ref, w3_ref,
                       b1_ref, b2_ref, b3_ref, o_ref):
            # bf16 MXU matmuls, f32 accumulation, f32 epilogue.
            xb = x_ref[...].astype(jnp.bfloat16)                     # (nf, tb)
            h1 = jnp.dot(w1_ref[...], xb,
                         preferred_element_type=jnp.float32)         # (h1p, tb)
            h1 = jnp.maximum(h1 + b1_ref[...], 0.0)
            h2 = jnp.dot(w2_ref[...], h1.astype(jnp.bfloat16),
                         preferred_element_type=jnp.float32)         # (h2p, tb)
            h2 = jnp.maximum(h2 + b2_ref[...], 0.0)
            out = jnp.dot(w3_ref[...], h2.astype(jnp.bfloat16),
                          preferred_element_type=jnp.float32)        # (outp, tb)
            out = out + b3_ref[...]
            # Lane-dense packed store: only the real output rows, batch on lanes.
            o_ref[...] = out[:n_out, :]

        out_t = pl.pallas_call(
            mlp_kernel,
            out_shape=jax.ShapeDtypeStruct((n_out, batch), jnp.float32),
            grid_spec=pltpu.PrefetchScalarGridSpec(
                num_scalar_prefetch=0,
                grid=grid,
                in_specs=[
                    # Only x is blocked over batch; weights/biases use constant
                    # index_maps so they are DMA'd once and stay VMEM-resident.
                    pl.BlockSpec((n_feature, tile_b), lambda i: (0, i)),
                    pl.BlockSpec((h1p, n_feature), lambda i: (0, 0)),
                    pl.BlockSpec((h2p, h1p), lambda i: (0, 0)),
                    pl.BlockSpec((outp, h2p), lambda i: (0, 0)),
                    pl.BlockSpec((h1p, 1), lambda i: (0, 0)),
                    pl.BlockSpec((h2p, 1), lambda i: (0, 0)),
                    pl.BlockSpec((outp, 1), lambda i: (0, 0)),
                ],
                out_specs=pl.BlockSpec((n_out, tile_b), lambda i: (0, i)),
            ),
            compiler_params=pltpu.CompilerParams(
                dimension_semantics=("parallel",),
                # NOTE: padded weights are ~65 KiB bf16, so no vmem_limit_bytes
                # or pl.Buffered(1) needed; revisit if layer widths grow toward
                # the v7x 64 MiB VMEM ceiling.
            ),
        )(x_t, w1t, w2t, w3t, b1t, b2t, b3t)

        return out_t.T                           # (batch, n_out)

    return jax.jit(forward)


def init_linear(key, fan_in, fan_out):
    """Deterministic PyTorch-style init: U(-1/sqrt(fan_in), 1/sqrt(fan_in))."""
    kw, kb = jax.random.split(key)
    bound = 1.0 / jnp.sqrt(fan_in)
    w = jax.random.uniform(kw, (fan_in, fan_out), jnp.float32, -bound, bound)
    b = jax.random.uniform(kb, (1, fan_out), jnp.float32, -bound, bound)
    return w, b


if __name__ == "__main__":
    # Net(n_feature=4, n_hidden1=32, n_hidden2=32, n_output=1), batch=8
    batch, n_feature, n_hidden1, n_hidden2, n_output = 8, 4, 32, 32, 1

    key = jax.random.PRNGKey(0)
    kx, k1, k2, k3 = jax.random.split(key, 4)

    x = jax.random.uniform(kx, (batch, n_feature), jnp.float32, -1.0, 1.0)
    w1, b1 = init_linear(k1, n_feature, n_hidden1)
    w2, b2 = init_linear(k2, n_hidden1, n_hidden2)
    w3, b3 = init_linear(k3, n_hidden2, n_output)

    forward = make_net_forward(w1, b1, w2, b2, w3, b3)
    out = forward(x)
    jax.block_until_ready(out)

    # Reference check in plain JAX (f32). Matmul operands are bf16 in the
    # kernel, so use a correspondingly looser tolerance.
    ref = jnp.maximum(x @ w1 + b1, 0.0)
    ref = jnp.maximum(ref @ w2 + b2, 0.0)
    ref = ref @ w3 + b3
    assert out.shape == (batch, n_output)
    assert jnp.allclose(out, ref, atol=2e-2, rtol=2e-2), "mismatch vs reference"

    print("KERNEL_OK")
</pallas_src>

<mosaic_0001>
module attributes {stable_mosaic.version = 11 : i64} {
  func.func @mlp_kernel(%arg0: i32, %arg1: memref<4x8xf32, #tpu.memory_space<vmem>>, %arg2: memref<128x4xbf16, #tpu.memory_space<vmem>>, %arg3: memref<128x128xbf16, #tpu.memory_space<vmem>>, %arg4: memref<8x128xbf16, #tpu.memory_space<vmem>>, %arg5: memref<128x1xf32, #tpu.memory_space<vmem>>, %arg6: memref<128x1xf32, #tpu.memory_space<vmem>>, %arg7: memref<8x1xf32, #tpu.memory_space<vmem>>, %arg8: memref<1x8xf32, #tpu.memory_space<vmem>>) attributes {dimension_semantics = [#tpu.dimension_semantics<parallel>], iteration_bounds = array<i64: 1>, scalar_prefetch = 0 : i64, scratch_operands = 0 : i64, tpu.core_type = #tpu.core_type<tc>, window_params = [{transform_indices = @transform_0, window_bounds = array<i64: 4, 8>}, {pipeline_mode = #tpu.pipeline_mode<synchronous>, transform_indices = @transform_1, window_bounds = array<i64: 128, 4>}, {pipeline_mode = #tpu.pipeline_mode<synchronous>, transform_indices = @transform_2, window_bounds = array<i64: 128, 128>}, {pipeline_mode = #tpu.pipeline_mode<synchronous>, transform_indices = @transform_3, window_bounds = array<i64: 8, 128>}, {pipeline_mode = #tpu.pipeline_mode<synchronous>, transform_indices = @transform_4, window_bounds = array<i64: 128, 1>}, {pipeline_mode = #tpu.pipeline_mode<synchronous>, transform_indices = @transform_5, window_bounds = array<i64: 128, 1>}, {pipeline_mode = #tpu.pipeline_mode<synchronous>, transform_indices = @transform_6, window_bounds = array<i64: 8, 1>}, {transform_indices = @transform_7, window_bounds = array<i64: 1, 8>}]} {
    %c0 = arith.constant 0 : index
    %c0_0 = arith.constant 0 : index
    %0 = vector.load %arg1[%c0, %c0_0] : memref<4x8xf32, #tpu.memory_space<vmem>>, vector<4x8xf32>
    %1 = arith.truncf %0 : vector<4x8xf32> to vector<4x8xbf16>
    %c0_1 = arith.constant 0 : index
    %c0_2 = arith.constant 0 : index
    %2 = vector.load %arg2[%c0_1, %c0_2] : memref<128x4xbf16, #tpu.memory_space<vmem>>, vector<128x4xbf16>
    %cst = arith.constant dense<0.000000e+00> : vector<128x8xf32>
    %3 = tpu.matmul %2, %1, %cst {dimension_numbers = #tpu.dot_dimension_numbers<[1], [0], [0], [1], [0, 0, 1, 1], [], []>} : vector<128x4xbf16>, vector<4x8xbf16>, vector<128x8xf32> -> vector<128x8xf32>
    %c0_3 = arith.constant 0 : index
    %c0_4 = arith.constant 0 : index
    %4 = vector.load %arg5[%c0_3, %c0_4] : memref<128x1xf32, #tpu.memory_space<vmem>>, vector<128x1xf32>
    %5 = vector.broadcast %4 : vector<128x1xf32> to vector<128x8xf32>
    %6 = arith.addf %3, %5 : vector<128x8xf32>
    %cst_5 = arith.constant 0.000000e+00 : f32
    %7 = vector.broadcast %cst_5 : f32 to vector<128x8xf32>
    %8 = arith.maximumf %6, %7 : vector<128x8xf32>
    %c0_6 = arith.constant 0 : index
    %c0_7 = arith.constant 0 : index
    %9 = vector.load %arg3[%c0_6, %c0_7] : memref<128x128xbf16, #tpu.memory_space<vmem>>, vector<128x128xbf16>
    %10 = arith.truncf %8 : vector<128x8xf32> to vector<128x8xbf16>
    %cst_8 = arith.constant dense<0.000000e+00> : vector<128x8xf32>
    %11 = tpu.matmul %9, %10, %cst_8 {dimension_numbers = #tpu.dot_dimension_numbers<[1], [0], [0], [1], [0, 0, 1, 1], [], []>} : vector<128x128xbf16>, vector<128x8xbf16>, vector<128x8xf32> -> vector<128x8xf32>
    %c0_9 = arith.constant 0 : index
    %c0_10 = arith.constant 0 : index
    %12 = vector.load %arg6[%c0_9, %c0_10] : memref<128x1xf32, #tpu.memory_space<vmem>>, vector<128x1xf32>
    %13 = vector.broadcast %12 : vector<128x1xf32> to vector<128x8xf32>
    %14 = arith.addf %11, %13 : vector<128x8xf32>
    %cst_11 = arith.constant 0.000000e+00 : f32
    %15 = vector.broadcast %cst_11 : f32 to vector<128x8xf32>
    %16 = arith.maximumf %14, %15 : vector<128x8xf32>
    %c0_12 = arith.constant 0 : index
    %c0_13 = arith.constant 0 : index
    %17 = vector.load %arg4[%c0_12, %c0_13] : memref<8x128xbf16, #tpu.memory_space<vmem>>, vector<8x128xbf16>
    %18 = arith.truncf %16 : vector<128x8xf32> to vector<128x8xbf16>
    %cst_14 = arith.constant dense<0.000000e+00> : vector<8x8xf32>
    %19 = tpu.matmul %17, %18, %cst_14 {dimension_numbers = #tpu.dot_dimension_numbers<[1], [0], [0], [1], [0, 0, 1, 1], [], []>} : vector<8x128xbf16>, vector<128x8xbf16>, vector<8x8xf32> -> vector<8x8xf32>
    %c0_15 = arith.constant 0 : index
    %c0_16 = arith.constant 0 : index
    %20 = vector.load %arg7[%c0_15, %c0_16] : memref<8x1xf32, #tpu.memory_space<vmem>>, vector<8x1xf32>
    %21 = vector.broadcast %20 : vector<8x1xf32> to vector<8x8xf32>
    %22 = arith.addf %19, %21 : vector<8x8xf32>
    %23 = vector.extract_strided_slice %22 {offsets = [0, 0], sizes = [1, 8], strides = [1, 1]} : vector<8x8xf32> to vector<1x8xf32>
    %c0_17 = arith.constant 0 : index
    %c0_18 = arith.constant 0 : index
    %24 = vector.load %arg8[%c0_17, %c0_18] : memref<1x8xf32, #tpu.memory_space<vmem>>, vector<1x8xf32>
    tpu.vector_store %arg8[%c0_17, %c0_18], %23 {strides = array<i32>} : memref<1x8xf32, #tpu.memory_space<vmem>>, vector<1x8xf32>,
    return
  }
  func.func @transform_0(%arg0: i32) -> (i32, i32) {
    %c0_i32 = arith.constant 0 : i32
    %c0_i32_0 = arith.constant 0 : i32
    return %c0_i32, %arg0 : i32, i32
  }
  func.func @transform_1(%arg0: i32) -> (i32, i32) {
    %c0_i32 = arith.constant 0 : i32
    %c0_i32_0 = arith.constant 0 : i32
    %c0_i32_1 = arith.constant 0 : i32
    return %c0_i32, %c0_i32_0 : i32, i32
  }
  func.func @transform_2(%arg0: i32) -> (i32, i32) {
    %c0_i32 = arith.constant 0 : i32
    %c0_i32_0 = arith.constant 0 : i32
    %c0_i32_1 = arith.constant 0 : i32
    return %c0_i32, %c0_i32_0 : i32, i32
  }
  func.func @transform_3(%arg0: i32) -> (i32, i32) {
    %c0_i32 = arith.constant 0 : i32
    %c0_i32_0 = arith.constant 0 : i32
    %c0_i32_1 = arith.constant 0 : i32
    return %c0_i32, %c0_i32_0 : i32, i32
  }
  func.func @transform_4(%arg0: i32) -> (i32, i32) {
    %c0_i32 = arith.constant 0 : i32
    %c0_i32_0 = arith.constant 0 : i32
    %c0_i32_1 = arith.constant 0 : i32
    return %c0_i32, %c0_i32_0 : i32, i32
  }
  func.func @transform_5(%arg0: i32) -> (i32, i32) {
    %c0_i32 = arith.constant 0 : i32
    %c0_i32_0 = arith.constant 0 : i32
    %c0_i32_1 = arith.constant 0 : i32
    return %c0_i32, %c0_i32_0 : i32, i32
  }
  func.func @transform_6(%arg0: i32) -> (i32, i32) {
    %c0_i32 = arith.constant 0 : i32
    %c0_i32_0 = arith.constant 0 : i32
    %c0_i32_1 = arith.constant 0 : i32
    return %c0_i32, %c0_i32_0 : i32, i32
  }
  func.func @transform_7(%arg0: i32) -> (i32, i32) {
    %c0_i32 = arith.constant 0 : i32
    %c0_i32_0 = arith.constant 0 : i32
    return %c0_i32, %arg0 : i32, i32
  }
}

</mosaic_0001>

<bundles_post_ra>
// kernel: forward.1
= control target key start
LH: loop header
LB: loop body
LE: loop exit
PB: predicated region body
PF: predicated region fallthrough
CT: control target
= control target key end

     0   :  { %12 = vsyncpa [#allocation3], 0  ;;  %s1074_s0 = inlined_call_operand.hbm [shape: f32[4,8], index: 0, kind: input, shape index: {}]   ;;  %s1075_s1 = inlined_call_operand.hbm [shape: bf16[128,4], index: 1, kind: input, shape index: {}]   ;;  %s1076_s2 = inlined_call_operand.hbm [shape: bf16[128,128], index: 2, kind: input, shape index: {}]   ;;  %s1077_s3 = inlined_call_operand.hbm [shape: bf16[8,128], index: 3, kind: input, shape index: {}]   ;;  %s1078_s4 = inlined_call_operand.hbm [shape: f32[128,1], index: 4, kind: input, shape index: {}]   ;;  %s1079_s5 = inlined_call_operand.hbm [shape: f32[128,1], index: 5, kind: input, shape index: {}]   ;;  %s1080_s6 = inlined_call_operand.hbm [shape: f32[8,1], index: 6, kind: input, shape index: {}]   ;;  %s1081_s7 = inlined_call_operand.hbm [shape: f32[1,8], index: 7, kind: output, shape index: {}]  }
   0x1   :  { %13 = vsyncpa [#allocation6], 0 }
   0x2   :  { %14 = vsyncpa [#allocation9], 0 }
   0x3   :  { %15 = vsyncpa [#allocation12], 0  ;;  %s32_s26 = sshll.u32 %s1075_s1, 4  ;;  %s33_s26 = int_to_ptr.hbm [resolvable:$true] %s32_s26 }
   0x4   :  { %16 = vsyncpa [#allocation4], 0  ;;  %s977_s27 = smov [#allocation5]   ;;  %s59_s8 = sshll.u32 %s1077_s3, 4  ;;  %s60_s8 = int_to_ptr.hbm [resolvable:$true] %s59_s8 }
   0x5   :  { %s34_s28 = sshll.u32 %s977_s27, 4  ;;  %s978_s9 = smov 64   ;;  %s35_s28 = int_to_ptr.vmem [resolvable:$true] %s34_s28 }
   0x6   :  { %s979_s10 = smov 4   ;;  %s980_s11 = smov [#allocation8]  }
   0x7   :  { %40 = dma.hbm_to_vmem [thread:$0]  %s33_s26, 1024, %s35_s28, [#allocation6], %s978_s9, %s978_s9, %s979_s10  }
   0x8   :  { %s61_s12 = sshll.u32 %s980_s11, 4  ;;  %s82_s14 = sshll.u32 %s1079_s5, 4  ;;  %s62_s12 = int_to_ptr.vmem [resolvable:$true] %s61_s12  ;;  %s83_s14 = int_to_ptr.hbm [resolvable:$true] %s82_s14 }
   0x9   :  { %64 = dma.hbm_to_vmem [thread:$0]  %s60_s8, 64, %s62_s12, [#allocation9]  }
   0xa   :  { %s981_s15 = smov [#allocation11]   ;;  %s22_s18 = sshll.u32 %s1074_s0, 4  ;;  %s23_s18 = int_to_ptr.hbm [resolvable:$true] %s22_s18 }
   0xb   :  { %s84_s16 = sshll.u32 %s981_s15, 4  ;;  %s982_s19 = smov 128   ;;  %s85_s16 = int_to_ptr.vmem [resolvable:$true] %s84_s16 }
   0xc   :  { %s983_s20 = smov 8   ;;  %s984_s21 = smov [#allocation2]  }
   0xd   :  { %90 = dma.hbm_to_vmem [thread:$0]  %s83_s14, 2048, %s85_s16, [#allocation12], %s982_s19, %s982_s19, %s983_s20  }
   0xe   :  { %s24_s22 = sshll.u32 %s984_s21, 4  ;;  %s45_s25 = sshll.u32 %s1076_s2, 4  ;;  %s25_s22 = int_to_ptr.vmem [resolvable:$true] %s24_s22  ;;  %s46_s25 = int_to_ptr.hbm [resolvable:$true] %s45_s25 }
   0xf   :  { %27 = dma.hbm_to_vmem [thread:$0]  %s23_s18, 64, %s25_s22, [#allocation3]  }
  0x10   :  { %s69_s27 = sshll.u32 %s1078_s4, 4  ;;  %s985_s28 = smov [#allocation7]   ;;  %s70_s27 = int_to_ptr.hbm [resolvable:$true] %s69_s27 }
  0x11   :  { %s47_s29 = sshll.u32 %s985_s28, 4  ;;  %s986_s0 = smov [#allocation10]   ;;  %s48_s29 = int_to_ptr.vmem [resolvable:$true] %s47_s29 }
  0x12   :  { %53 = dma.hbm_to_vmem [thread:$0]  %s46_s25, 1024, %s48_s29, [#allocation6], %s978_s9, %s978_s9, %s979_s10  }
  0x13   :  { %s71_s30 = sshll.u32 %s986_s0, 4  ;;  %s96_s2 = sshll.u32 %s1080_s6, 4  ;;  %s72_s30 = int_to_ptr.vmem [resolvable:$true] %s71_s30  ;;  %s97_s2 = int_to_ptr.hbm [resolvable:$true] %s96_s2 }
  0x14   :  { %77 = dma.hbm_to_vmem [thread:$0]  %s70_s27, 2048, %s72_s30, [#allocation9], %s982_s19, %s982_s19, %s983_s20  }
  0x15   :  { %s987_s12 = smov [#allocation13]  }
  0x16   :  { %s98_s1 = sshll.u32 %s987_s12, 4  ;;  %s99_s1 = int_to_ptr.vmem [resolvable:$true] %s98_s1 }
  0x17   :  { %101 = dma.hbm_to_vmem [thread:$0]  %s97_s2, 128, %s99_s1, [#allocation12]  }
  0x18   :  { %967 = dma.done.wait [#allocation3], 64  }
  0x19   :  { %968 = vsyncadd [#allocation3], 4294967232 }
  0x1a   :  { %969 = dma.done.wait [#allocation6], 2048  }
  0x1b   :  { %970 = vsyncadd [#allocation6], 4294965248 }
  0x1c   :  { %971 = dma.done.wait [#allocation9], 2112  }
  0x1d   :  { %972 = vsyncadd [#allocation9], 4294965184 }
  0x1e   :  { %973 = dma.done.wait [#allocation12], 2176  }
  0x1f   :  { %974 = vsyncadd [#allocation12], 4294965120  ;;  %v988_v0 = vmov 0   ;;  %v163_v1 = vld [vmem:[#allocation10 + $0x70] sm:$0xff]  ;;  %v131_v2 = vld [vmem:[#allocation2] sm:$0xf] }
  0x20   :  { %772 = vset.pattern.permute.xlu0 %v988_v0  ;;  %774 = vset.pattern.permute.xlu2 %v988_v0  ;;  %vm310_vm0 = vcmask 1041408   ;;  %v132_v3 = vpack.c.bf16 %v131_v2, %v131_v2  ;;  %v161_v4 = vld [vmem:[#allocation10 + $0x60] sm:$0xff]  ;;  %v159_v5 = vld [vmem:[#allocation10 + $0x50] sm:$0xff]  ;;  %vm285_vm1 = vcmask 31744   ;;  %v164_v9 = vld [vmem:[#allocation10 + $0x78] sm:$0xff]  ;;  %s989_s4 = smov [#allocation14]  }
  0x21   :  { %773 = vset.pattern.permute.xlu1 %v988_v0  ;;  %237 = vperm.xlu0 %772, %v163_v1   ;;  %v734_v7 = vld [vmem:[#allocation5] sm:$0xff]  ;;  %v740_v8 = vld [vmem:[#allocation5 + $0x30] sm:$0xff]  ;;  %v735_v15 = vld [vmem:[#allocation5 + $0x8] sm:$0xff]  ;;  %s647_s6 = sshll.u32 %s989_s4, 4  ;;  %s649_s13 = sshll.u32 %s1081_s7, 4  ;;  %vm640_vm2 = vcmask 57344   ;;  %s648_s6 = int_to_ptr.vmem [resolvable:$true] %s647_s6  ;;  %s650_s13 = int_to_ptr.hbm [resolvable:$true] %s649_s13 }
  0x22   :  { %227 = vperm.xlu1 %773, %v161_v4   ;;  %217 = vperm.xlu2 %774, %v159_v5   ;;  %v312_v6 = vsel %vm310_vm0, %v132_v3, 0  ;;  %v162_v10 = vld [vmem:[#allocation10 + $0x68] sm:$0xff]  ;;  %v160_v11 = vld [vmem:[#allocation10 + $0x58] sm:$0xff]  ;;  %v157_v12 = vld [vmem:[#allocation10 + $0x40] sm:$0xff] }
  0x23   :  { %321 = vmatpush.bf16.msra.mxu0 %v312_v6  ;;  %750 = vmatpush.bf16.msra.mxu2 %v312_v6  ;;  %v158_v13 = vld [vmem:[#allocation10 + $0x48] sm:$0xff]  ;;  %v155_v14 = vld [vmem:[#allocation10 + $0x30] sm:$0xff]  ;;  %v156_v17 = vld [vmem:[#allocation10 + $0x38] sm:$0xff] }
  0x24   :  { %v741_v16 = vld [vmem:[#allocation5 + $0x38] sm:$0xff]  ;;  %v154_v18 = vld [vmem:[#allocation10 + $0x28] sm:$0xff]  ;;  %v153_v19 = vld [vmem:[#allocation10 + $0x20] sm:$0xff] }
  0x25   :  { %v151_v20 = vld [vmem:[#allocation10 + $0x10] sm:$0xff]  ;;  %v152_v21 = vld [vmem:[#allocation10 + $0x18] sm:$0xff]  ;;  %v149_v22 = vld [vmem:[#allocation10] sm:$0xff] }
  0x26   :  { %694 = vmatmul.msk.bf16.vlgmr.msra.gmra.mxu0 %vm285_vm1, %v734_v7  ;;  %700 = vmatmul.msk.bf16.vlgmr.msra.gmra.mxu2 %vm285_vm1, %v740_v8  ;;  %v736_v23 = vld [vmem:[#allocation5 + $0x10] sm:$0xff]  ;;  %v418_v26 = vld [vmem:[#allocation11 + $0x78] sm:$0xff]  ;;  %v415_v27 = vld [vmem:[#allocation11 + $0x60] sm:$0xff] }
  0x27   :  { %v150_v24 = vld [vmem:[#allocation10 + $0x8] sm:$0xff]  ;;  %v417_v25 = vld [vmem:[#allocation11 + $0x70] sm:$0xff]  ;;  %v414_v31 = vld [vmem:[#allocation11 + $0x58] sm:$0xff] }
  0x28   :  { %v416_v28 = vld [vmem:[#allocation11 + $0x68] sm:$0xff]  ;;  %v413_v29 = vld [vmem:[#allocation11 + $0x50] sm:$0xff]  ;;  %v411_v32 = vld [vmem:[#allocation11 + $0x40] sm:$0xff] }
  0x29   :  { %242 = vperm.xlu0 %772, %v164_v9   ;;  %v737_v30 = vld [vmem:[#allocation5 + $0x18] sm:$0xff]  ;;  %v412_v33 = vld [vmem:[#allocation11 + $0x48] sm:$0xff]  ;;  %v407_v36 = vld [vmem:[#allocation11 + $0x20] sm:$0xff] }
  0x2a   :  { %232 = vperm.xlu1 %773, %v162_v10   ;;  %222 = vperm.xlu2 %774, %v160_v11   ;;  %v409_v34 = vld [vmem:[#allocation11 + $0x30] sm:$0xff]  ;;  %v410_v35 = vld [vmem:[#allocation11 + $0x38] sm:$0xff]  ;;  %v408_v38 = vld [vmem:[#allocation11 + $0x28] sm:$0xff] }
  0x2b   :  { %v738_v37 = vld [vmem:[#allocation5 + $0x20] sm:$0xff]  ;;  %v405_v39 = vld [vmem:[#allocation11 + $0x10] sm:$0xff]  ;;  %v404_v42 = vld [vmem:[#allocation11 + $0x8] sm:$0xff] }
  0x2c   :  { %v406_v40 = vld [vmem:[#allocation11 + $0x18] sm:$0xff]  ;;  %v403_v41 = vld [vmem:[#allocation11] sm:$0xff] }
  0x2d   :  { %v739_v43 = vld [vmem:[#allocation5 + $0x28] sm:$0xff] }
  0x2e   :  { %v621_v44 = vld [vmem:[#allocation13] sm:$0xff] }
  0x31   :  { %207 = vperm.xlu0 %772, %v157_v12  }
  0x32   :  { %212 = vperm.xlu1 %773, %v158_v13   ;;  %197 = vperm.xlu2 %774, %v155_v14  }
  0x36   :  { %695 = vmatmul.msk.bf16.gmra.mxu0 %vm285_vm1, %v735_v15  ;;  %701 = vmatmul.msk.bf16.gmra.mxu2 %vm285_vm1, %v741_v16 }
  0x39   :  { %202 = vperm.xlu0 %772, %v156_v17  }
  0x3a   :  { %192 = vperm.xlu2 %774, %v154_v18   ;;  %187 = vperm.xlu1 %773, %v153_v19  }
  0x41   :  { %177 = vperm.xlu0 %772, %v151_v20  }
  0x42   :  { %182 = vperm.xlu1 %773, %v152_v21   ;;  %167 = vperm.xlu2 %774, %v149_v22  }
  0x46   :  { %696 = vmatmul.msk.bf16.gmra.mxu0 %vm285_vm1, %v736_v23 }
  0x49   :  { %172 = vperm.xlu0 %772, %v150_v24  }
  0x4a   :  { %491 = vperm.xlu1 %773, %v417_v25   ;;  %496 = vperm.xlu2 %774, %v418_v26  }
  0x51   :  { %481 = vperm.xlu0 %772, %v415_v27  }
  0x52   :  { %486 = vperm.xlu1 %773, %v416_v28   ;;  %471 = vperm.xlu2 %774, %v413_v29  }
  0x56   :  { %697 = vmatmul.msk.bf16.gmra.mxu0 %vm285_vm1, %v737_v30 }
  0x59   :  { %476 = vperm.xlu0 %772, %v414_v31  }
  0x5a   :  { %461 = vperm.xlu1 %773, %v411_v32   ;;  %466 = vperm.xlu2 %774, %v412_v33  }
  0x61   :  { %451 = vperm.xlu0 %772, %v409_v34  }
  0x62   :  { %456 = vperm.xlu1 %773, %v410_v35   ;;  %441 = vperm.xlu2 %774, %v407_v36  }
  0x66   :  { %698 = vmatmul.msk.bf16.gmra.mxu0 %vm285_vm1, %v738_v37 }
  0x69   :  { %446 = vperm.xlu0 %772, %v408_v38  }
  0x6a   :  { %431 = vperm.xlu1 %773, %v405_v39   ;;  %436 = vperm.xlu2 %774, %v406_v40  }
  0x71   :  { %421 = vperm.xlu0 %772, %v403_v41  }
  0x72   :  { %426 = vperm.xlu1 %773, %v404_v42   ;;  %624 = vperm.xlu2 %774, %v621_v44  }
  0x76   :  { %699 = vmatmul.msk.bf16.gmra.mxu0 %vm285_vm1, %v739_v43 }
  0x7c   :  { %v218_v45 = vpop.permute.xlu2 %217 }
  0x84   :  { %v223_v48 = vpop.permute.xlu2 %222 }
  0x8c   :  { %v198_v51 = vpop.permute.xlu2 %197 }
  0x93   :  { %v238_v46 = vpop.permute.xlu0 %237 }
  0x94   :  { %v228_v47 = vpop.permute.xlu1 %227  ;;  %v193_v58 = vpop.permute.xlu2 %192 }
  0x9b   :  { %v243_v49 = vpop.permute.xlu0 %242 }
  0x9c   :  { %v233_v50 = vpop.permute.xlu1 %232  ;;  %v168_v63 = vpop.permute.xlu2 %167 }
  0xa3   :  { %v208_v52 = vpop.permute.xlu0 %207  ;;  %v323_v53 = vpop.f32.mrf.mxu0 }
  0xa4   :  { %v213_v54 = vpop.permute.xlu1 %212  ;;  %v324_v0 = vadd.f32 %v323_v53, %v168_v63 }
  0xa6   :  { %v363_v8 = vmax.f32 %v324_v0, 0.0 }
  0xa9   :  { %v353_v55 = vpop.f32.mrf.mxu2 }
  0xaa   :  { %v354_v14 = vadd.f32 %v353_v55, %v228_v47  ;;  %v743_v55 = vld [vmem:[#allocation7 + $0x8] sm:$0xff] }
  0xab   :  { %v203_v56 = vpop.permute.xlu0 %202  ;;  %v325_v57 = vpop.f32.mrf.mxu0 }
  0xac   :  { %v188_v59 = vpop.permute.xlu1 %187  ;;  %v375_v21 = vmax.f32 %v354_v14, 0.0 }
  0xb1   :  { %v355_v60 = vpop.f32.mrf.mxu2 }
  0xb2   :  { %v356_v15 = vadd.f32 %v355_v60, %v233_v50  ;;  %v749_v60 = vld [vmem:[#allocation7 + $0x38] sm:$0xff] }
  0xb3   :  { %v178_v61 = vpop.permute.xlu0 %177  ;;  %v328_v62 = vpop.f32.mrf.mxu0 }
  0xb4   :  { %v183_v1 = vpop.permute.xlu1 %182  ;;  %v329_v3 = vadd.f32 %v328_v62, %v178_v61  ;;  %v376_v22 = vmax.f32 %v356_v15, 0.0 }
  0xb6   :  { %v365_v10 = vmax.f32 %v329_v3, 0.0  ;;  %v401_v25 = vpack.c.bf16 %v376_v22, %v375_v21 }
  0xb9   :  { %v358_v2 = vpop.f32.mrf.mxu2 }
  0xba   :  { %v359_v12 = vadd.f32 %v358_v2, %v238_v46 }
  0xbb   :  { %v173_v4 = vpop.permute.xlu0 %172  ;;  %v330_v6 = vpop.f32.mrf.mxu0 }
  0xbc   :  { %v326_v5 = vadd.f32 %v325_v57, %v173_v4  ;;  %v331_v7 = vadd.f32 %v330_v6, %v183_v1  ;;  %v377_v18 = vmax.f32 %v359_v12, 0.0  ;;  %v744_v57 = vld [vmem:[#allocation7 + $0x10] sm:$0xff] }
  0xbe   :  { %v364_v9 = vmax.f32 %v326_v5, 0.0  ;;  %v366_v11 = vmax.f32 %v331_v7, 0.0  ;;  %v492_v5 = vpop.permute.xlu1 %491  ;;  %v497_v7 = vpop.permute.xlu2 %496 }
  0xc0   :  { %v395_v13 = vpack.c.bf16 %v364_v9, %v363_v8  ;;  %v396_v16 = vpack.c.bf16 %v366_v11, %v365_v10 }
  0xc1   :  { %v360_v17 = vpop.f32.mrf.mxu2 }
  0xc2   :  { %v361_v19 = vadd.f32 %v360_v17, %v243_v49 }
  0xc3   :  { %v333_v20 = vpop.f32.mrf.mxu0  ;;  %v482_v11 = vpop.permute.xlu0 %481 }
  0xc4   :  { %v378_v23 = vmax.f32 %v361_v19, 0.0  ;;  %v334_v49 = vadd.f32 %v333_v20, %v188_v59  ;;  %v745_v59 = vld [vmem:[#allocation7 + $0x18] sm:$0xff] }
  0xc6   :  { %v402_v24 = vpack.c.bf16 %v378_v23, %v377_v18  ;;  %v487_v9 = vpop.permute.xlu1 %486  ;;  %v472_v12 = vpop.permute.xlu2 %471 }
  0xc8   :  { %547 = vmatpush.bf16.msra.mxu1 %v402_v24  ;;  %751 = vmatpush.bf16.msra.mxu3 %v402_v24 }
  0xcb   :  { %v335_v26 = vpop.f32.mrf.mxu0 }
  0xcc   :  { %548 = vmatpush.bf16.msra.mxu1 %v401_v25  ;;  %752 = vmatpush.bf16.msra.mxu3 %v401_v25  ;;  %v336_v44 = vadd.f32 %v335_v26, %v193_v58  ;;  %v748_v58 = vld [vmem:[#allocation7 + $0x30] sm:$0xff] }
  0xce   :  { %v462_v15 = vpop.permute.xlu1 %461  ;;  %v467_v17 = vpop.permute.xlu2 %466 }
  0xd3   :  { %v338_v27 = vpop.f32.mrf.mxu0 }
  0xd4   :  { %v339_v42 = vadd.f32 %v338_v27, %v198_v51  ;;  %v742_v51 = vld [vmem:[#allocation7] sm:$0xff] }
  0xd6   :  { %v369_v50 = vmax.f32 %v339_v42, 0.0  ;;  %v457_v26 = vpop.permute.xlu1 %456 }
  0xdb   :  { %v340_v28 = vpop.f32.mrf.mxu0 }
  0xdc   :  { %v341_v39 = vadd.f32 %v340_v28, %v203_v56  ;;  %v747_v56 = vld [vmem:[#allocation7 + $0x28] sm:$0xff] }
  0xde   :  { %v370_v46 = vmax.f32 %v341_v39, 0.0 }
  0xe0   :  { %v398_v53 = vpack.c.bf16 %v370_v46, %v369_v50 }
  0xe3   :  { %v343_v29 = vpop.f32.mrf.mxu0 }
  0xe4   :  { %v344_v36 = vadd.f32 %v343_v29, %v208_v52 }
  0xe6   :  { %v371_v43 = vmax.f32 %v344_v36, 0.0  ;;  %v442_v36 = vpop.permute.xlu2 %441 }
  0xeb   :  { %v345_v30 = vpop.f32.mrf.mxu0 }
  0xec   :  { %v346_v34 = vadd.f32 %v345_v30, %v213_v54  ;;  %v746_v54 = vld [vmem:[#allocation7 + $0x20] sm:$0xff] }
  0xee   :  { %v372_v40 = vmax.f32 %v346_v34, 0.0 }
  0xf0   :  { %v399_v47 = vpack.c.bf16 %v372_v40, %v371_v43  ;;  %v432_v43 = vpop.permute.xlu1 %431 }
  0xf3   :  { %v348_v31 = vpop.f32.mrf.mxu0 }
  0xf4   :  { %v349_v32 = vadd.f32 %v348_v31, %v218_v45  ;;  %v368_v45 = vmax.f32 %v336_v44, 0.0 }
  0xf6   :  { %v373_v37 = vmax.f32 %v349_v32, 0.0 }
  0xfb   :  { %v350_v33 = vpop.f32.mrf.mxu0 }
  0xfc   :  { %v351_v35 = vadd.f32 %v350_v33, %v223_v48  ;;  %v367_v48 = vmax.f32 %v334_v49, 0.0 }
  0xfe   :  { %v374_v38 = vmax.f32 %v351_v35, 0.0  ;;  %v397_v52 = vpack.c.bf16 %v368_v45, %v367_v48 }
 0x100   :  { %v400_v41 = vpack.c.bf16 %v374_v38, %v373_v37 }
 0x102   :  { %549 = vmatpush.bf16.msra.mxu1 %v400_v41  ;;  %753 = vmatpush.bf16.msra.mxu3 %v400_v41 }
 0x106   :  { %550 = vmatpush.bf16.msra.mxu1 %v399_v47  ;;  %754 = vmatpush.bf16.msra.mxu3 %v399_v47 }
 0x10a   :  { %551 = vmatpush.bf16.msra.mxu1 %v398_v53  ;;  %755 = vmatpush.bf16.msra.mxu3 %v398_v53 }
 0x10e   :  { %552 = vmatpush.bf16.msra.mxu1 %v397_v52  ;;  %756 = vmatpush.bf16.msra.mxu3 %v397_v52  ;;  %v437_v52 = vpop.permute.xlu2 %436 }
 0x112   :  { %553 = vmatpush.bf16.msra.mxu1 %v396_v16  ;;  %757 = vmatpush.bf16.msra.mxu3 %v396_v16  ;;  %v477_v16 = vpop.permute.xlu0 %476 }
 0x116   :  { %554 = vmatpush.bf16.msra.mxu1 %v395_v13  ;;  %758 = vmatpush.bf16.msra.mxu3 %v395_v13 }
 0x119   :  { %555 = vmatmul.bf16.vlgmr.msra.gmra.mxu1 %v742_v51  ;;  %575 = vmatmul.bf16.vlgmr.msra.gmra.mxu3 %v746_v54 }
 0x11a   :  { %v452_v30 = vpop.permute.xlu0 %451 }
 0x122   :  { %v447_v47 = vpop.permute.xlu0 %446 }
 0x129   :  { %560 = vmatmul.bf16.gmra.mxu1 %v743_v55  ;;  %580 = vmatmul.bf16.gmra.mxu3 %v747_v56 }
 0x139   :  { %565 = vmatmul.bf16.gmra.mxu1 %v744_v57  ;;  %585 = vmatmul.bf16.gmra.mxu3 %v748_v58  ;;  %v427_v58 = vpop.permute.xlu1 %426 }
 0x149   :  { %570 = vmatmul.bf16.gmra.mxu1 %v745_v59  ;;  %590 = vmatmul.bf16.gmra.mxu3 %v749_v60 }
 0x196   :  { %v1065_v61 = vpop.f32.mrf.mxu1 }
 0x19c   :  { %v576_v62 = vpop.f32.mrf.mxu3 }
 0x19d   :  { %v577_v38 = vadd.f32 %v576_v62, %v462_v15 }
 0x19e   :  { %v1067_v63 = vpop.f32.mrf.mxu1 }
 0x19f   :  { %v604_v44 = vmax.f32 %v577_v38, 0.0  ;;  %v559_v59 = vadd.f32 %v1067_v63, %v427_v58  ;;  %v625_v63 = vpop.permute.xlu2 %624 }
 0x1a4   :  { %v578_v0 = vpop.f32.mrf.mxu3 }
 0x1a5   :  { %v579_v33 = vadd.f32 %v578_v0, %v467_v17  ;;  %v422_v0 = vpop.permute.xlu0 %421 }
 0x1a6   :  { %v561_v1 = vpop.f32.mrf.mxu1 }
 0x1a7   :  { %v605_v40 = vmax.f32 %v579_v33, 0.0  ;;  %v562_v56 = vadd.f32 %v561_v1, %v432_v43 }
 0x1a9   :  { %v617_v45 = vpack.c.bf16 %v605_v40, %v604_v44 }
 0x1ac   :  { %v581_v2 = vpop.f32.mrf.mxu3 }
 0x1ad   :  { %v582_v31 = vadd.f32 %v581_v2, %v472_v12  ;;  %v557_v2 = vadd.f32 %v1065_v61, %v422_v0 }
 0x1ae   :  { %v563_v4 = vpop.f32.mrf.mxu1 }
 0x1af   :  { %v606_v39 = vmax.f32 %v582_v31, 0.0  ;;  %v564_v51 = vadd.f32 %v563_v4, %v437_v52 }
 0x1b1   :  { %v599_v60 = vmax.f32 %v564_v51, 0.0 }
 0x1b4   :  { %v583_v3 = vpop.f32.mrf.mxu3 }
 0x1b5   :  { %v584_v27 = vadd.f32 %v583_v3, %v477_v16  ;;  %v598_v3 = vmax.f32 %v562_v56, 0.0 }
 0x1b6   :  { %v566_v8 = vpop.f32.mrf.mxu1 }
 0x1b7   :  { %v607_v34 = vmax.f32 %v584_v27, 0.0  ;;  %v567_v53 = vadd.f32 %v566_v8, %v442_v36  ;;  %v612_v8 = vld [vmem:[#allocation8] sm:$0xf] }
 0x1b9   :  { %v618_v42 = vpack.c.bf16 %v607_v34, %v606_v39  ;;  %v600_v57 = vmax.f32 %v567_v53, 0.0 }
 0x1bc   :  { %v586_v6 = vpop.f32.mrf.mxu3 }
 0x1bd   :  { %v587_v23 = vadd.f32 %v586_v6, %v482_v11  ;;  %v614_v6 = vpack.c.bf16 %v599_v60, %v598_v3 }
 0x1be   :  { %v568_v13 = vpop.f32.mrf.mxu1 }
 0x1bf   :  { %v608_v32 = vmax.f32 %v587_v23, 0.0  ;;  %v569_v49 = vadd.f32 %v568_v13, %v447_v47 }
 0x1c1   :  { %v601_v54 = vmax.f32 %v569_v49, 0.0 }
 0x1c3   :  { %v615_v62 = vpack.c.bf16 %v601_v54, %v600_v57 }
 0x1c4   :  { %v588_v10 = vpop.f32.mrf.mxu3 }
 0x1c5   :  { %v589_v21 = vadd.f32 %v588_v10, %v487_v9 }
 0x1c6   :  { %v571_v19 = vpop.f32.mrf.mxu1 }
 0x1c7   :  { %v609_v28 = vmax.f32 %v589_v21, 0.0  ;;  %v572_v46 = vadd.f32 %v571_v19, %v452_v30 }
 0x1c9   :  { %v619_v35 = vpack.c.bf16 %v609_v28, %v608_v32  ;;  %v602_v48 = vmax.f32 %v572_v46, 0.0 }
 0x1cc   :  { %v591_v14 = vpop.f32.mrf.mxu3 }
 0x1cd   :  { %v592_v18 = vadd.f32 %v591_v14, %v492_v5  ;;  %v597_v5 = vmax.f32 %v559_v59, 0.0 }
 0x1ce   :  { %v573_v37 = vpop.f32.mrf.mxu1 }
 0x1cf   :  { %v610_v24 = vmax.f32 %v592_v18, 0.0  ;;  %v574_v41 = vadd.f32 %v573_v37, %v457_v26 }
 0x1d1   :  { %v603_v50 = vmax.f32 %v574_v41, 0.0 }
 0x1d3   :  { %v616_v55 = vpack.c.bf16 %v603_v50, %v602_v48 }
 0x1d4   :  { %v593_v20 = vpop.f32.mrf.mxu3 }
 0x1d5   :  { %v594_v22 = vadd.f32 %v593_v20, %v497_v7  ;;  %v596_v7 = vmax.f32 %v557_v2, 0.0 }
 0x1d7   :  { %v611_v25 = vmax.f32 %v594_v22, 0.0  ;;  %v613_v4 = vpack.c.bf16 %v597_v5, %v596_v7 }
 0x1d9   :  { %v620_v29 = vpack.c.bf16 %v611_v25, %v610_v24 }
 0x1db   :  { %627 = vmatpush.bf16.msrb.mxu2 %v620_v29 }
 0x1df   :  { %628 = vmatpush.bf16.msrb.mxu2 %v619_v35 }
 0x1e3   :  { %629 = vmatpush.bf16.msrb.mxu2 %v618_v42 }
 0x1e7   :  { %630 = vmatpush.bf16.msrb.mxu2 %v617_v45 }
 0x1eb   :  { %631 = vmatpush.bf16.msrb.mxu2 %v616_v55 }
 0x1ef   :  { %632 = vmatpush.bf16.msrb.mxu2 %v615_v62 }
 0x1f3   :  { %633 = vmatpush.bf16.msrb.mxu2 %v614_v6 }
 0x1f7   :  { %634 = vmatpush.bf16.msrb.mxu2 %v613_v4 }
 0x1fa   :  { %635 = vmatmul.bf16.vlgmr.msrb.gmra.mxu2 %v612_v8 }
 0x27d   :  { %v636_v1 = vpop.f32.mrf.mxu2 }
 0x27e   :  { %v637_v61 = vadd.f32 %v636_v1, %v625_v63 }
 0x280   :  { %641 = vst.msk [vmem:[#allocation14] sm:$0x1] %vm640_vm2, %v637_v61 }
 0x281   :  { %652 = dma.vmem_to_hbm [thread:$0]  %s648_s6, 16, %s650_s13, [#allocation4]  }
 0x285   :  { %v638_v9 = vpop.f32.mrf.mxu2 }
 0x286   :  { %975 = dma.done.wait [#allocation4], 16  }
 0x287   :  { %976 = vsyncadd [#allocation4], 4294967280 }
 0x288   :  { %657 = vsyncpa [#allocation3], 1 }
 0x289   :  { %658 = vsyncpa [#allocation6], 1 }
 0x28a   :  { %659 = vsyncpa [#allocation9], 1 }
 0x28b   :  { %660 = vsyncpa [#allocation12], 1 }
 0x28c   :  { %661 = vsyncpa [#allocation4], 1 }

</bundles_post_ra>
